<compile_context>
chip_gen: v7x
topology: tpu7x:2x2x1
jax: 0.10.0
libtpu: 0.0.40
codegen_flags: <defaults>
</compile_context>

<pallas_src>
import functools
from itertools import combinations

import numpy as np
import jax
import jax.numpy as jnp
from jax.experimental import pallas as pl
from jax.experimental.pallas import tpu as pltpu


def _round_up(x, m):
    return ((x + m - 1) // m) * m


def _negative_samples_kernel(ea_ref, eall_ref, sq_ref, labrow_ref, labcol_ref,
                             out_ref, thr_ref, *, margin, n_valid):
    # ea_ref:     (TM, D)   f32  anchor-embedding block (rows i*TM .. i*TM+TM)
    # eall_ref:   (NP, D)   f32  all embeddings (padded), resident every step
    # sq_ref:     (NP, 1)   f32  squared norms ||e_j||^2 (padded)
    # labrow_ref: (1, TM)   i32  anchor labels for this block
    # labcol_ref: (NP, 1)   i32  all labels (padded)
    # out_ref:    (1, 1)    i32  SMEM accumulator, shared across grid steps
    # thr_ref:    (NP, TM)  f32  VMEM scratch holding masked thresholds
    i = pl.program_id(0)
    tm = ea_ref.shape[0]
    npad = eall_ref.shape[0]
    big = jnp.float32(1e30)

    # gram_t[j, a] = <e_j, e_a>   (MXU, f32 accumulate)
    gram_t = jax.lax.dot_general(
        eall_ref[...], ea_ref[...], (((1,), (1,)), ((), ())),
        preferred_element_type=jnp.float32)                       # (NP, TM)

    # s[j, a] = ||e_j||^2 - 2<e_a,e_j> = D[a,j] - ||e_a||^2 (anchor norm cancels)
    s = sq_ref[...] - 2.0 * gram_t                                # (NP, TM)

    other = jax.lax.broadcasted_iota(jnp.int32, (npad, tm), 0)    # j / n index
    anchor = i * tm + jax.lax.broadcasted_iota(jnp.int32, (npad, tm), 1)

    same = labcol_ref[...] == labrow_ref[...]                     # (NP, TM)
    other_ok = other < n_valid                                    # mask padded rows
    anchor_ok = anchor < n_valid

    # (anchor a, positive j): same label, a < j, both real samples.
    pair = same & (anchor < other) & other_ok & anchor_ok
    # negatives n: different label, real sample.
    neg = jnp.logical_and(jnp.logical_not(same), other_ok)

    # Fold masks once, outside the O(N^3) loop.
    thr_ref[...] = jnp.where(pair, s + jnp.float32(margin), -big)
    dneg = jnp.where(neg, s, big)

    def body(j, acc):
        t = thr_ref[pl.ds(j, 1), :]                               # (1, TM)
        hits = (dneg < t).astype(jnp.int32)                       # (NP, TM)
        return acc + jnp.sum(hits, axis=0, keepdims=True)         # (1, TM) i32

    acc0 = jnp.zeros((1, tm), dtype=jnp.int32)
    # Smallest index that can be a positive for this anchor block is i*TM + 1.
    acc = jax.lax.fori_loop(i * tm + 1, npad, body, acc0)
    partial = jnp.sum(acc)                                        # i32 scalar

    @pl.when(i == 0)
    def _():
        out_ref[0, 0] = jnp.int32(0)

    out_ref[0, 0] = out_ref[0, 0] + partial


def negative_samples_forward(embeddings, target, margin):
    """Pallas equivalent of NegativeSamples(margin).forward(embeddings, target).

    Returns a (1, 1) int32 array; element [0, 0] is the hard-triplet count.
    """
    n, d = embeddings.shape
    emb = embeddings.astype(jnp.float32)
    lab = jnp.asarray(target).astype(jnp.int32)

    # Anchor-row tiling: a single (8-padded) block for small N, 128-row blocks
    # otherwise.  NP is always a multiple of TM (and TM is 8- or 128-aligned).
    if n <= 128:
        npad = _round_up(n, 8)
        tm = npad
    else:
        tm = 128
        npad = _round_up(n, tm)
    grid = npad // tm
    pad = npad - n

    emb_p = jnp.pad(emb, ((0, pad), (0, 0)))
    lab_p = jnp.pad(lab, (0, pad), constant_values=-1)
    sq = jnp.sum(emb_p * emb_p, axis=1, keepdims=True)            # (NP, 1)
    lab_col = lab_p.reshape(npad, 1)
    lab_row = lab_p.reshape(1, npad)

    kernel = functools.partial(_negative_samples_kernel,
                               margin=float(margin), n_valid=n)

    out = pl.pallas_call(
        kernel,
        out_shape=jax.ShapeDtypeStruct((1, 1), jnp.int32),
        grid_spec=pltpu.PrefetchScalarGridSpec(
            num_scalar_prefetch=0,
            grid=(grid,),
            in_specs=[
                pl.BlockSpec((tm, d), lambda i: (i, 0)),          # anchor block
                pl.BlockSpec((npad, d), lambda i: (0, 0)),        # all embeddings
                pl.BlockSpec((npad, 1), lambda i: (0, 0)),        # squared norms
                pl.BlockSpec((1, tm), lambda i: (0, i)),          # anchor labels
                pl.BlockSpec((npad, 1), lambda i: (0, 0)),        # all labels
            ],
            out_specs=pl.BlockSpec((1, 1), lambda i: (0, 0),
                                   memory_space=pltpu.MemorySpace.SMEM),
            scratch_shapes=[pltpu.VMEM((npad, tm), jnp.float32)],
        ),
        compiler_params=pltpu.CompilerParams(
            dimension_semantics=("arbitrary",),
            vmem_limit_bytes=32 * 1024 * 1024,
        ),
    )(emb_p, emb_p, sq, lab_row, lab_col)
    return out


def _reference_count(embeddings, target, margin):
    """NumPy re-implementation of the PyTorch module for verification."""
    emb = np.asarray(embeddings, dtype=np.float32)
    labels = np.asarray(target)
    dist = (-2.0 * emb @ emb.T
            + (emb ** 2).sum(axis=1)[None, :]
            + (emb ** 2).sum(axis=1)[:, None])
    count = 0
    for lab in set(labels.tolist()):
        mask = labels == lab
        idx = np.where(mask)[0]
        if len(idx) < 2:
            continue
        neg = np.where(~mask)[0]
        for a, p in combinations(idx, 2):
            loss = dist[a, p] - dist[a, neg] + margin
            count += int((loss > 0).sum())
    return count


if __name__ == "__main__":
    key = jax.random.PRNGKey(0)
    margin = 1.0
    k_emb, k_emb2, k_lab2 = jax.random.split(key, 3)

    # Small case matching the module's usage (single block, N=8, D=32): exact.
    n, d = 8, 32
    embeddings = jax.random.normal(k_emb, (n, d), dtype=jnp.float32)
    target = jnp.array([0, 0, 1, 1, 2, 2, 0, 1], dtype=jnp.int32)

    out = jax.block_until_ready(negative_samples_forward(embeddings, target, margin))
    kernel_count = int(out[0, 0])
    ref_count = _reference_count(np.asarray(embeddings), np.asarray(target), margin)
    assert kernel_count == ref_count, (kernel_count, ref_count)

    # Larger case exercising the tiled / padded multi-block path
    # (N=200 -> NP=256, TM=128, grid=2).  Tiny slack for f32 boundary reordering.
    n2, d2 = 200, 64
    emb2 = jax.random.normal(k_emb2, (n2, d2), dtype=jnp.float32)
    target2 = jax.random.randint(k_lab2, (n2,), 0, 5, dtype=jnp.int32)
    out2 = jax.block_until_ready(negative_samples_forward(emb2, target2, margin))
    k2 = int(out2[0, 0])
    r2 = _reference_count(np.asarray(emb2), np.asarray(target2), margin)
    assert abs(k2 - r2) <= max(5, r2 // 10000), (k2, r2)

    print("KERNEL_OK")
</pallas_src>

<mosaic_0001>
module attributes {stable_mosaic.version = 11 : i64} {
  func.func @_negative_samples_kernel(%arg0: i32, %arg1: memref<8x32xf32, #tpu.memory_space<vmem>>, %arg2: memref<8x32xf32, #tpu.memory_space<vmem>>, %arg3: memref<8x1xf32, #tpu.memory_space<vmem>>, %arg4: memref<1x8xi32, #tpu.memory_space<vmem>>, %arg5: memref<8x1xi32, #tpu.memory_space<vmem>>, %arg6: memref<1x1xi32, #tpu.memory_space<smem>>, %arg7: memref<8x8xf32, #tpu.memory_space<vmem>>) attributes {dimension_semantics = [#tpu.dimension_semantics<arbitrary>], iteration_bounds = array<i64: 1>, scalar_prefetch = 0 : i64, scratch_operands = 1 : i64, tpu.core_type = #tpu.core_type<tc>, window_params = [{transform_indices = @transform_0, window_bounds = array<i64: 8, 32>}, {pipeline_mode = #tpu.pipeline_mode<synchronous>, transform_indices = @transform_1, window_bounds = array<i64: 8, 32>}, {pipeline_mode = #tpu.pipeline_mode<synchronous>, transform_indices = @transform_2, window_bounds = array<i64: 8, 1>}, {transform_indices = @transform_3, window_bounds = array<i64: 1, 8>}, {pipeline_mode = #tpu.pipeline_mode<synchronous>, transform_indices = @transform_4, window_bounds = array<i64: 8, 1>}, {transform_indices = @transform_5, window_bounds = array<i64: 1, 1>}]} {
    %c0 = arith.constant 0 : index
    %c0_0 = arith.constant 0 : index
    %0 = vector.load %arg2[%c0, %c0_0] : memref<8x32xf32, #tpu.memory_space<vmem>>, vector<8x32xf32>
    %c0_1 = arith.constant 0 : index
    %c0_2 = arith.constant 0 : index
    %1 = vector.load %arg1[%c0_1, %c0_2] : memref<8x32xf32, #tpu.memory_space<vmem>>, vector<8x32xf32>
    %cst = arith.constant dense<0.000000e+00> : vector<8x8xf32>
    %2 = tpu.matmul %0, %1, %cst {dimension_numbers = #tpu.dot_dimension_numbers<[1], [1], [0], [0], [0, 0, 1, 0], [], []>} : vector<8x32xf32>, vector<8x32xf32>, vector<8x8xf32> -> vector<8x8xf32>
    %c0_3 = arith.constant 0 : index
    %c0_4 = arith.constant 0 : index
    %3 = vector.load %arg3[%c0_3, %c0_4] : memref<8x1xf32, #tpu.memory_space<vmem>>, vector<8x1xf32>
    %cst_5 = arith.constant 2.000000e+00 : f32
    %4 = vector.broadcast %cst_5 : f32 to vector<8x8xf32>
    %5 = arith.mulf %4, %2 : vector<8x8xf32>
    %6 = vector.broadcast %3 : vector<8x1xf32> to vector<8x8xf32>
    %7 = arith.subf %6, %5 : vector<8x8xf32>
    %8 = tpu.iota {dimensions = array<i32: 0>} : vector<8x8xi32>
    %c8_i32 = arith.constant 8 : i32
    %9 = arith.muli %arg0, %c8_i32 : i32
    %10 = tpu.iota {dimensions = array<i32: 1>} : vector<8x8xi32>
    %11 = vector.broadcast %9 : i32 to vector<8x8xi32>
    %12 = arith.addi %11, %10 : vector<8x8xi32>
    %c0_6 = arith.constant 0 : index
    %c0_7 = arith.constant 0 : index
    %13 = vector.load %arg5[%c0_6, %c0_7] : memref<8x1xi32, #tpu.memory_space<vmem>>, vector<8x1xi32>
    %c0_8 = arith.constant 0 : index
    %c0_9 = arith.constant 0 : index
    %14 = vector.load %arg4[%c0_8, %c0_9] : memref<1x8xi32, #tpu.memory_space<vmem>>, vector<1x8xi32>
    %15 = vector.broadcast %13 : vector<8x1xi32> to vector<8x8xi32>
    %16 = vector.broadcast %14 : vector<1x8xi32> to vector<8x8xi32>
    %17 = arith.cmpi eq, %15, %16 : vector<8x8xi32>
    %c8_i32_10 = arith.constant 8 : i32
    %18 = vector.broadcast %c8_i32_10 : i32 to vector<8x8xi32>
    %19 = arith.cmpi slt, %8, %18 : vector<8x8xi32>
    %c8_i32_11 = arith.constant 8 : i32
    %20 = vector.broadcast %c8_i32_11 : i32 to vector<8x8xi32>
    %21 = arith.cmpi slt, %12, %20 : vector<8x8xi32>
    %22 = arith.cmpi slt, %12, %8 : vector<8x8xi32>
    %23 = arith.andi %17, %22 : vector<8x8xi1>
    %24 = arith.andi %23, %19 : vector<8x8xi1>
    %25 = arith.andi %24, %21 : vector<8x8xi1>
    %cst_12 = arith.constant dense<true> : vector<8x8xi1>
    %26 = arith.xori %17, %cst_12 : vector<8x8xi1>
    %27 = arith.andi %26, %19 : vector<8x8xi1>
    %cst_13 = arith.constant 1.000000e+00 : f32
    %28 = vector.broadcast %cst_13 : f32 to vector<8x8xf32>
    %29 = arith.addf %7, %28 : vector<8x8xf32>
    %cst_14 = arith.constant 0.000000e+00 : f32
    %cst_15 = arith.constant 1.000000e+30 : f32
    %30 = arith.subf %cst_14, %cst_15 : f32
    %31 = vector.broadcast %30 : f32 to vector<8x8xf32>
    %32 = arith.select %25, %29, %31 : vector<8x8xi1>, vector<8x8xf32>
    %c0_16 = arith.constant 0 : index
    %c0_17 = arith.constant 0 : index
    %33 = vector.load %arg7[%c0_16, %c0_17] : memref<8x8xf32, #tpu.memory_space<vmem>>, vector<8x8xf32>
    tpu.vector_store %arg7[%c0_16, %c0_17], %32 {strides = array<i32>} : memref<8x8xf32, #tpu.memory_space<vmem>>, vector<8x8xf32>,
    %cst_18 = arith.constant 1.000000e+30 : f32
    %34 = vector.broadcast %cst_18 : f32 to vector<8x8xf32>
    %35 = arith.select %27, %7, %34 : vector<8x8xi1>, vector<8x8xf32>
    %c0_i32 = arith.constant 0 : i32
    %36 = vector.broadcast %c0_i32 : i32 to vector<1x8xi32>
    %c8_i32_19 = arith.constant 8 : i32
    %37 = arith.muli %arg0, %c8_i32_19 : i32
    %c1_i32 = arith.constant 1 : i32
    %38 = arith.addi %37, %c1_i32 : i32
    %c8_i32_20 = arith.constant 8 : i32
    %39 = arith.subi %c8_i32_20, %38 : i32
    %40 = arith.addi %38, %39 : i32
    %c1_i32_21 = arith.constant 1 : i32
    %41 = scf.for %arg8 = %38 to %40 step %c1_i32_21 iter_args(%arg9 = %36) -> (vector<1x8xi32>)  : i32 {
      %52 = arith.index_cast %arg8 : i32 to index
      %c0_29 = arith.constant 0 : index
      %53 = vector.load %arg7[%52, %c0_29] : memref<8x8xf32, #tpu.memory_space<vmem>>, vector<1x8xf32>
      %54 = vector.broadcast %53 : vector<1x8xf32> to vector<8x8xf32>
      %55 = arith.cmpf olt, %35, %54 : vector<8x8xf32>
      %56 = arith.extui %55 : vector<8x8xi1> to vector<8x8xi32>
      %cst_30 = arith.constant dense<0> : vector<8xi32>
      %57 = vector.multi_reduction <add>, %56, %cst_30 [0] : vector<8x8xi32> to vector<8xi32>
      %58 = vector.shape_cast %57 : vector<8xi32> to vector<1x8xi32>
      %59 = arith.addi %arg9, %58 : vector<1x8xi32>
      scf.yield %59 : vector<1x8xi32>
    }
    %42 = vector.shape_cast %41 : vector<1x8xi32> to vector<1x1x8xi32>
    %cst_22 = arith.constant dense<0> : vector<1xi32>
    %43 = vector.multi_reduction <add>, %42, %cst_22 [1, 2] : vector<1x1x8xi32> to vector<1xi32>
    %44 = vector.shape_cast %43 : vector<1xi32> to vector<1x1x1xi32>
    %45 = vector.extract %44[0, 0, 0] : i32 from vector<1x1x1xi32>
    %c0_i32_23 = arith.constant 0 : i32
    %46 = arith.cmpi eq, %arg0, %c0_i32_23 : i32
    %47 = arith.extui %46 : i1 to i32
    %c0_i32_24 = arith.constant 0 : i32
    %48 = arith.cmpi ne, %47, %c0_i32_24 : i32
    scf.if %48 {
      %c0_i32_29 = arith.constant 0 : i32
      %c0_30 = arith.constant 0 : index
      %c0_31 = arith.constant 0 : index
      %52 = memref.load %arg6[%c0_30, %c0_31] : memref<1x1xi32, #tpu.memory_space<smem>>
      memref.store %c0_i32_29, %arg6[%c0_30, %c0_31] : memref<1x1xi32, #tpu.memory_space<smem>>
    } else {
    }
    %c0_25 = arith.constant 0 : index
    %c0_26 = arith.constant 0 : index
    %49 = memref.load %arg6[%c0_25, %c0_26] : memref<1x1xi32, #tpu.memory_space<smem>>
    %50 = arith.addi %49, %45 : i32
    %c0_27 = arith.constant 0 : index
    %c0_28 = arith.constant 0 : index
    %51 = memref.load %arg6[%c0_27, %c0_28] : memref<1x1xi32, #tpu.memory_space<smem>>
    memref.store %50, %arg6[%c0_27, %c0_28] : memref<1x1xi32, #tpu.memory_space<smem>>
    return
  }
  func.func @transform_0(%arg0: i32) -> (i32, i32) {
    %c0_i32 = arith.constant 0 : i32
    %c0_i32_0 = arith.constant 0 : i32
    return %arg0, %c0_i32 : i32, i32
  }
  func.func @transform_1(%arg0: i32) -> (i32, i32) {
    %c0_i32 = arith.constant 0 : i32
    %c0_i32_0 = arith.constant 0 : i32
    %c0_i32_1 = arith.constant 0 : i32
    return %c0_i32, %c0_i32_0 : i32, i32
  }
  func.func @transform_2(%arg0: i32) -> (i32, i32) {
    %c0_i32 = arith.constant 0 : i32
    %c0_i32_0 = arith.constant 0 : i32
    %c0_i32_1 = arith.constant 0 : i32
    return %c0_i32, %c0_i32_0 : i32, i32
  }
  func.func @transform_3(%arg0: i32) -> (i32, i32) {
    %c0_i32 = arith.constant 0 : i32
    %c0_i32_0 = arith.constant 0 : i32
    return %c0_i32, %arg0 : i32, i32
  }
  func.func @transform_4(%arg0: i32) -> (i32, i32) {
    %c0_i32 = arith.constant 0 : i32
    %c0_i32_0 = arith.constant 0 : i32
    %c0_i32_1 = arith.constant 0 : i32
    return %c0_i32, %c0_i32_0 : i32, i32
  }
  func.func @transform_5(%arg0: i32) -> (i32, i32) {
    %c0_i32 = arith.constant 0 : i32
    %c0_i32_0 = arith.constant 0 : i32
    %c0_i32_1 = arith.constant 0 : i32
    return %c0_i32, %c0_i32_0 : i32, i32
  }
}

</mosaic_0001>

<bundles_post_ra>
// kernel: tpu_custom_call.1
= control target key start
LH: loop header
LB: loop body
LE: loop exit
PB: predicated region body
PF: predicated region fallthrough
CT: control target
= control target key end

     0   :  { %10 = vsyncpa [#allocation4], 0  ;;  %vm23_vm0 = vcmask 261120   ;;  %v273_v1 = vmov 0.0   ;;  %vm274_vm1 = vmmov 0   ;;  %v275_v4 = vmov 0   ;;  %s345_s0 = inlined_call_operand.vmem [shape: f32[8,32], index: 0, kind: input, shape index: {}]   ;;  %s346_s1 = inlined_call_operand.vmem [shape: f32[8,32], index: 1, kind: input, shape index: {}]   ;;  %s347_s2 = inlined_call_operand.vmem [shape: f32[8,1], index: 2, kind: input, shape index: {}]   ;;  %s348_s3 = inlined_call_operand.vmem [shape: s32[1,8], index: 3, kind: input, shape index: {}]   ;;  %s349_s4 = inlined_call_operand.vmem [shape: s32[8,1], index: 4, kind: input, shape index: {}]   ;;  %s350_s5 = inlined_call_operand.hbm [shape: s32[1,1], index: 5, kind: output, shape index: {}]  }
   0x1   :  { %v22_v0 = vld [vmem:[%s345_s0] sm:$0xff]  ;;  %214 = vmatprep.subr.mxu0 %v273_v1  ;;  %216 = vmatprep.mubr.msk.f32.mxu0 %vm274_vm1, %v273_v1  ;;  %v108_v7 = vlaneseq  ;;  %vm276_vm6 = vmmov 1   ;;  %vm135_vm8 = vcmask 64512   ;;  %v265_v20 = vmov 0  }
   0x2   :  { %v100_v2 = vld [vmem:[%s347_s2] sm:$0xff]  ;;  %215 = vmatpush3.xpose.msk.msra.mxu0 %vm23_vm0, %v22_v0  ;;  %244 = vset.pattern.permute.xlu0 %v275_v4 }
   0x3   :  { %v21_v3 = vld [vmem:[%s346_s1] sm:$0xff]  ;;  %104 = vperm.xlu0 %244, %v100_v2   ;;  %v109_v8 = vshrl.u32 %v108_v7, 7  ;;  %v112_v9 = vand.u32 127, %v108_v7  ;;  %s269_s1 = smov 1  }
   0x4   :  { %v115_v5 = vld [vmem:[%s349_s4] sm:$0xff] }
   0x5   :  { %217 = vmatmul.mubr.msk.f32.vlgmr.msra.gmra.mrb[0].mxu0 %vm23_vm0, %v21_v3  ;;  %v210_v10 = vld [vmem:[%s348_s3] ss:$0 sm:$0xff]  ;;  %vm127_vm2 = vcmp.lt.s32.totalorder %v112_v9, %v109_v8  ;;  %vm126_vm4 = vcmp.lt.s32.totalorder %v112_v9, 8 }
   0x7   :  { %118 = vperm.xlu0 %244, %v115_v5  }
  0x82   :  { %v105_v6 = vpop.permute.xlu0 %104 }
  0x86   :  { %v119_v11 = vpop.permute.xlu0 %118 }
  0x87   :  { %vm124_vm3 = vcmp.eq.s32.totalorder %v119_v11, %v210_v10 }
  0x88   :  { %vm128_vm5 = vmand %vm124_vm3, %vm127_vm2 }
  0x89   :  { %vm324_vm7 = vmxor %vm124_vm3, %vm276_vm6 }
  0x8a   :  { %vm130_vm9 = vmand %vm128_vm5, %vm126_vm4 }
  0xd8   :  { %v96_v12 = vpop.f32.mrb[0].mxu0 }
  0xd9   :  { %v101_v13 = vmul.f32 2.0, %v96_v12  ;;  %v218_v14 = vpop.f32.mrb[1].mxu0 }
  0xdb   :  { %v107_v15 = vsub.f32 %v105_v6, %v101_v13 }
  0xdd   :  { %v133_v17 = vadd.f32 1.0, %v107_v15  ;;  %v137_v18 = vsel %vm324_vm7, %v107_v15, 1e+30 }
  0xdf   :  { %v134_v19 = vsel %vm130_vm9, %v133_v17, -1e+30 }
  0xe0   :  { %136 = vst.msk [vmem:[#allocation2] sm:$0xff] %vm135_vm8, %v134_v19 }
  0xe1 LB: > { %s146_s3 = scalar_lea.vmem [#allocation2], %s271_s1  ;;  %v277_v22 = vmov 0   ;;  %s142_s1 = sadd.s32 1, %s271_s1   ;;  %s271_s1 = sphi %s269_s1, %s142_s1   ;;  %v267_v20 = vphi %v265_v20, %v266_v20  }
  0xe2   : > { %p141_p0 = scmp.ge.s32.totalorder %s142_s1, 8 }
  0xe3   :  { %s245_s28 = scalar_lea.hbm (%p141_p0), %s350_s5, 16 }
  0xe4   :  { %p246_p1 = scmp.ne.s32.totalorder (%p141_p0), %s350_s5, %s245_s28  ;;  %p249_p2 = scmp.lt.u32.totalorder (%p141_p0), %s245_s28, %s350_s5 }
  0xe6   :  { %p251_p3 = pnand (%p141_p0), %p249_p2, %p246_p1 }
  0xe7   : > { %v211_v21 = vld [vmem:[%s146_s3] ss:$0 sm:$0xff] }
  0xe8   : > { %vm152_vm10 = vcmp.lt.f32.partialorder %v137_v18, %v211_v21 }
  0xe9   : > { %v153_v23 = vsel %vm152_vm10, 1, %v277_v22 }
  0xea   : > { %v154_v24 = vsel %vm135_vm8, %v153_v23, 0 }
  0xeb   : > { %v155_v25 = vrot.slane %v154_v24, 4 }
  0xed   : > { %v156_v26 = vadd.s32 %v155_v25, %v154_v24 }
  0xef   : > { %v157_v27 = vrot.slane %v156_v26, 2 }
  0xf1   : > { %v158_v28 = vadd.s32 %v157_v27, %v156_v26 }
  0xf3   : > { %v159_v29 = vrot.slane %v158_v28, 1  ;;  %144 = sbr.rel (!%p141_p0) target bundleno = 225 (0xe1), region = 54 }
  0xf5   : > { %v160_v30 = vadd.s32 %v159_v29, %v158_v28 }
  0xf7   : > { %v161_v31 = vadd.s32 %v267_v20, %v160_v30  }
  0xf9   : > { %v266_v20 = vmov %v161_v31   ;;  %v162_v32 = vsel (%p141_p0), %vm135_vm8, %v161_v31, 0 }
  0xfa   :  { %v164_v33 = vshrl.u32 %v162_v32, 16  ;;  %v163_v34 = vand.u32 65535, %v162_v32 }
  0xfc   :  { %v166_v35 = vcvt.s32.f32 %v164_v33  ;;  %v165_v36 = vcvt.s32.f32 %v163_v34 }
  0xfe   :  { %169 = vadd.xlane.f32.xlu0 %v166_v35 }
 0x102   :  { %167 = vadd.xlane.f32.xlu0 %v165_v36 }
 0x18b   :  { %v170_v37 = vpop.xlane.xlu0 %169 }
 0x18c   :  { %v172_v38 = vcvt.f32.s32 %v170_v37 }
 0x18e   :  { %v173_v40 = vshll.u32 %v172_v38, 16 }
 0x18f   :  { %v168_v39 = vpop.xlane.xlu0 %167 }
 0x190   :  { %v171_v41 = vcvt.f32.s32 %v168_v39 }
 0x192   :  { %v174_v42 = vadd.s32 %v173_v40, %v171_v41 }
 0x194   :  { %219 = vpush %v174_v42 }
 0x1c5   :  { %s220_s4 = spop %219 }
 0x1c6   :  { %185 = sst [smem:[#allocation3]] %s220_s4 }
 0x1c7   :  { %254 = shalt.err (!%p251_p3)
}
 0x1c8   :  { %s278_s8 = smov [#allocation3]  }
 0x1c9   :  { %193 = dma.smem_to_hbm %s278_s8, 16, %s350_s5, [#allocation4]  }
 0x1ca   :  { %263 = dma.done.wait [#allocation4], 16  }
 0x1cb   :  { %264 = vsyncadd [#allocation4], 4294967280 }
 0x1cc   :  { %197 = sfence }
 0x1cd   :  { %198 = vsyncpa [#allocation4], 1 }

</bundles_post_ra>
